<compile_context>
chip_gen: v7x
topology: tpu7x:2x2x1
jax: 0.10.0
libtpu: 0.0.40
codegen_flags: <defaults>
</compile_context>

<pallas_src>
import math

import jax
import jax.numpy as jnp
from jax.experimental import pallas as pl
from jax.experimental.pallas import tpu as pltpu

B = 2    # batch
L = 8    # sequence length (tokenizer max_length)
H = 32   # intermediate_dims (hidden size)
NL = 2   # config['model']['num_layer']
C = 5    # num_labels
NEG = -1.0e9


# ---------------------------------------------------------------------------
# Fused kernel: QKV projection + masked softmax attention + multi-layer Elman
# RNN + mean pooling + classifier + log_softmax. Single grid point; the whole
# working set is a few KB so everything lives in VMEM for one invocation.
# ---------------------------------------------------------------------------
def _fused_kernel(x_ref, amask_ref, wqkv_ref, bqkv_ref, wih_ref, whh_ref,
                  brnn_ref, wc_ref, bc_ref, out_ref):
    # One lane-dense QKV matmul for the whole batch: (B*L, H) @ (H, 3H).
    qkv = jnp.dot(x_ref[...], wqkv_ref[...],
                  preferred_element_type=jnp.float32) + bqkv_ref[...]
    inv_scale = jnp.float32(1.0 / math.sqrt(H))

    # Attention per batch element (static slices, fully unrolled; B=2).
    att = []
    for b in range(B):
        rows = slice(b * L, (b + 1) * L)
        q = qkv[rows, 0:H]
        k = qkv[rows, H:2 * H]
        v = qkv[rows, 2 * H:3 * H]
        # q @ k.T without an explicit transpose op.
        scores = jax.lax.dot_general(
            q, k, (((1,), (1,)), ((), ())),
            preferred_element_type=jnp.float32) * inv_scale
        scores = scores + amask_ref[b]                       # additive mask (1, L)
        scores = scores - jnp.max(scores, axis=-1, keepdims=True)
        p = jnp.exp(scores)
        w = p * pl.reciprocal(jnp.sum(p, axis=-1, keepdims=True), approx=True)
        att.append(jnp.dot(w, v, preferred_element_type=jnp.float32))  # (L, H)

    # Multi-layer Elman RNN: nn.RNN(batch_first=False) recurs over dim 0 (=B),
    # with L acting as the RNN batch; att[t] is exactly time step t.
    xs = att
    for layer in range(NL):
        wih_t = wih_ref[layer]                               # (H, H) pre-transposed
        whh_t = whh_ref[layer]                               # (H, H) pre-transposed
        bias = brnn_ref[layer]                               # (1, H) = b_ih + b_hh
        h = jnp.zeros((L, H), jnp.float32)
        new_xs = []
        for t in range(B):
            h = jnp.tanh(
                jnp.dot(xs[t], wih_t, preferred_element_type=jnp.float32)
                + jnp.dot(h, whh_t, preferred_element_type=jnp.float32)
                + bias)
            new_xs.append(h)
        xs = new_xs

    # Mean pooling over dim 1 (=L) per sample; no (B, L, H) stack materialized.
    pooled = jnp.concatenate(
        [jnp.mean(xs[t], axis=0, keepdims=True) for t in range(B)], axis=0)  # (B, H)

    logits = jnp.dot(pooled, wc_ref[...],
                     preferred_element_type=jnp.float32) + bc_ref[...]       # (B, C)
    logits = logits - jnp.max(logits, axis=-1, keepdims=True)
    out_ref[...] = logits - jnp.log(jnp.sum(jnp.exp(logits), axis=-1,
                                            keepdims=True))


def rnn_attention_forward(embbed, mask, p):
    # Host-side layout plumbing (not compute): flatten input, build additive
    # mask, concatenate + pre-transpose Q/K/V weights, pre-transpose RNN and
    # classifier weights, pre-add the two RNN biases.
    x2d = embbed.reshape(B * L, H)
    amask = jnp.where(mask == 0.0, jnp.float32(NEG), jnp.float32(0.0))  # (B,1,L)
    wqkv_t = jnp.concatenate([p['wq'].T, p['wk'].T, p['wv'].T], axis=1)  # (H, 3H)
    bqkv = jnp.concatenate([p['bq'], p['bk'], p['bv']], axis=1)          # (1, 3H)
    wih_t = jnp.transpose(p['w_ih'], (0, 2, 1))                          # (NL, H, H)
    whh_t = jnp.transpose(p['w_hh'], (0, 2, 1))                          # (NL, H, H)
    brnn = p['b_ih'] + p['b_hh']                                         # (NL, 1, H)
    wc_t = p['wc'].T                                                     # (H, C)

    vmem = pl.BlockSpec(memory_space=pltpu.MemorySpace.VMEM)
    return pl.pallas_call(
        _fused_kernel,
        out_shape=jax.ShapeDtypeStruct((B, C), jnp.float32),
        in_specs=[vmem] * 9,
        out_specs=vmem,
    )(x2d, amask, wqkv_t, bqkv, wih_t, whh_t, brnn, wc_t, p['bc'])


# ---------------------------------------------------------------------------
# Pure-JAX reference (mirrors the PyTorch forward semantics) for validation.
# ---------------------------------------------------------------------------
def reference(embbed, mask, p):
    x = embbed
    q = x @ p['wq'].T + p['bq']
    k = x @ p['wk'].T + p['bk']
    v = x @ p['wv'].T + p['bv']
    scores = jnp.einsum('blh,bmh->blm', q, k) / jnp.sqrt(jnp.float32(H))
    scores = jnp.where(mask == 0.0, NEG, scores)
    attn = jax.nn.softmax(scores, axis=-1)
    x = jnp.einsum('blm,bmh->blh', attn, v)
    for layer in range(NL):
        h = jnp.zeros((L, H), jnp.float32)
        outs = []
        for t in range(B):
            h = jnp.tanh(x[t] @ p['w_ih'][layer].T + p['b_ih'][layer, 0]
                         + h @ p['w_hh'][layer].T + p['b_hh'][layer, 0])
            outs.append(h)
        x = jnp.stack(outs, axis=0)
    pooled = jnp.mean(x, axis=1)
    logits = pooled @ p['wc'].T + p['bc']
    return jax.nn.log_softmax(logits, axis=-1)


def init_params(key):
    ks = jax.random.split(key, 12)
    lim = 1.0 / math.sqrt(H)
    u = lambda k, shape: jax.random.uniform(k, shape, jnp.float32, -lim, lim)
    return dict(
        wq=u(ks[0], (H, H)), bq=u(ks[1], (1, H)),
        wk=u(ks[2], (H, H)), bk=u(ks[3], (1, H)),
        wv=u(ks[4], (H, H)), bv=u(ks[5], (1, H)),
        w_ih=u(ks[6], (NL, H, H)), w_hh=u(ks[7], (NL, H, H)),
        b_ih=u(ks[8], (NL, 1, H)), b_hh=u(ks[9], (NL, 1, H)),
        wc=u(ks[10], (C, H)), bc=u(ks[11], (1, C)),
    )


if __name__ == "__main__":
    key = jax.random.PRNGKey(0)
    k_emb, k_par = jax.random.split(key)
    embbed = jax.random.normal(k_emb, (B, L, H), jnp.float32)
    mask = jnp.ones((B, 1, L), jnp.float32)
    mask = mask.at[1, 0, 6:].set(0.0)          # pad the tail of sample 1
    params = init_params(k_par)

    logits = rnn_attention_forward(embbed, mask, params)
    jax.block_until_ready(logits)

    ref = reference(embbed, mask, params)
    assert logits.shape == (B, C)
    assert bool(jnp.allclose(logits, ref, atol=2e-3, rtol=2e-3))
    print("KERNEL_OK")
</pallas_src>

<mosaic_0001>
module attributes {stable_mosaic.version = 11 : i64} {
  func.func @_fused_kernel(%arg0: memref<16x32xf32, #tpu.memory_space<vmem>>, %arg1: memref<2x1x8xf32, #tpu.memory_space<vmem>>, %arg2: memref<32x96xf32, #tpu.memory_space<vmem>>, %arg3: memref<1x96xf32, #tpu.memory_space<vmem>>, %arg4: memref<2x32x32xf32, #tpu.memory_space<vmem>>, %arg5: memref<2x32x32xf32, #tpu.memory_space<vmem>>, %arg6: memref<2x1x32xf32, #tpu.memory_space<vmem>>, %arg7: memref<32x5xf32, #tpu.memory_space<vmem>>, %arg8: memref<1x5xf32, #tpu.memory_space<vmem>>, %arg9: memref<2x5xf32, #tpu.memory_space<vmem>>) attributes {dimension_semantics = [], scalar_prefetch = 0 : i64, scratch_operands = 0 : i64, tpu.core_type = #tpu.core_type<tc>} {
    %c0 = arith.constant 0 : index
    %c0_0 = arith.constant 0 : index
    %0 = vector.load %arg0[%c0, %c0_0] : memref<16x32xf32, #tpu.memory_space<vmem>>, vector<16x32xf32>
    %c0_1 = arith.constant 0 : index
    %c0_2 = arith.constant 0 : index
    %1 = vector.load %arg2[%c0_1, %c0_2] : memref<32x96xf32, #tpu.memory_space<vmem>>, vector<32x96xf32>
    %cst = arith.constant dense<0.000000e+00> : vector<16x96xf32>
    %2 = tpu.matmul %0, %1, %cst {dimension_numbers = #tpu.dot_dimension_numbers<[1], [0], [0], [1], [0, 0, 1, 1], [], []>} : vector<16x32xf32>, vector<32x96xf32>, vector<16x96xf32> -> vector<16x96xf32>
    %c0_3 = arith.constant 0 : index
    %c0_4 = arith.constant 0 : index
    %3 = vector.load %arg3[%c0_3, %c0_4] : memref<1x96xf32, #tpu.memory_space<vmem>>, vector<1x96xf32>
    %4 = vector.broadcast %3 : vector<1x96xf32> to vector<16x96xf32>
    %5 = arith.addf %2, %4 : vector<16x96xf32>
    %6 = vector.extract_strided_slice %5 {offsets = [0, 0], sizes = [8, 32], strides = [1, 1]} : vector<16x96xf32> to vector<8x32xf32>
    %7 = vector.extract_strided_slice %5 {offsets = [0, 32], sizes = [8, 32], strides = [1, 1]} : vector<16x96xf32> to vector<8x32xf32>
    %8 = vector.extract_strided_slice %5 {offsets = [0, 64], sizes = [8, 32], strides = [1, 1]} : vector<16x96xf32> to vector<8x32xf32>
    %cst_5 = arith.constant dense<0.000000e+00> : vector<8x8xf32>
    %9 = tpu.matmul %6, %7, %cst_5 {dimension_numbers = #tpu.dot_dimension_numbers<[1], [1], [0], [0], [0, 0, 1, 0], [], []>} : vector<8x32xf32>, vector<8x32xf32>, vector<8x8xf32> -> vector<8x8xf32>
    %cst_6 = arith.constant 0.176776692 : f32
    %10 = vector.broadcast %cst_6 : f32 to vector<8x8xf32>
    %11 = arith.mulf %9, %10 : vector<8x8xf32>
    %c0_7 = arith.constant 0 : index
    %c0_8 = arith.constant 0 : index
    %c0_9 = arith.constant 0 : index
    %12 = vector.load %arg1[%c0_7, %c0_8, %c0_9] : memref<2x1x8xf32, #tpu.memory_space<vmem>>, vector<1x1x8xf32>
    %13 = vector.shape_cast %12 : vector<1x1x8xf32> to vector<1x8xf32>
    %14 = vector.broadcast %13 : vector<1x8xf32> to vector<8x8xf32>
    %15 = arith.addf %11, %14 : vector<8x8xf32>
    %cst_10 = arith.constant dense<0xFF800000> : vector<8xf32>
    %16 = vector.multi_reduction <maximumf>, %15, %cst_10 [1] : vector<8x8xf32> to vector<8xf32>
    %17 = vector.shape_cast %16 : vector<8xf32> to vector<8x1xf32>
    %18 = vector.broadcast %17 : vector<8x1xf32> to vector<8x8xf32>
    %19 = arith.subf %15, %18 : vector<8x8xf32>
    %20 = math.exp %19 : vector<8x8xf32>
    %cst_11 = arith.constant dense<0.000000e+00> : vector<8xf32>
    %21 = vector.multi_reduction <add>, %20, %cst_11 [1] : vector<8x8xf32> to vector<8xf32>
    %22 = vector.shape_cast %21 : vector<8xf32> to vector<8x1xf32>
    %23 = tpu.reciprocal %22 {approx = true} : vector<8x1xf32> -> vector<8x1xf32>
    %24 = vector.broadcast %23 : vector<8x1xf32> to vector<8x8xf32>
    %25 = arith.mulf %20, %24 : vector<8x8xf32>
    %cst_12 = arith.constant dense<0.000000e+00> : vector<8x32xf32>
    %26 = tpu.matmul %25, %8, %cst_12 {dimension_numbers = #tpu.dot_dimension_numbers<[1], [0], [0], [1], [0, 0, 1, 1], [], []>} : vector<8x8xf32>, vector<8x32xf32>, vector<8x32xf32> -> vector<8x32xf32>
    %27 = vector.extract_strided_slice %5 {offsets = [8, 0], sizes = [8, 32], strides = [1, 1]} : vector<16x96xf32> to vector<8x32xf32>
    %28 = vector.extract_strided_slice %5 {offsets = [8, 32], sizes = [8, 32], strides = [1, 1]} : vector<16x96xf32> to vector<8x32xf32>
    %29 = vector.extract_strided_slice %5 {offsets = [8, 64], sizes = [8, 32], strides = [1, 1]} : vector<16x96xf32> to vector<8x32xf32>
    %cst_13 = arith.constant dense<0.000000e+00> : vector<8x8xf32>
    %30 = tpu.matmul %27, %28, %cst_13 {dimension_numbers = #tpu.dot_dimension_numbers<[1], [1], [0], [0], [0, 0, 1, 0], [], []>} : vector<8x32xf32>, vector<8x32xf32>, vector<8x8xf32> -> vector<8x8xf32>
    %cst_14 = arith.constant 0.176776692 : f32
    %31 = vector.broadcast %cst_14 : f32 to vector<8x8xf32>
    %32 = arith.mulf %30, %31 : vector<8x8xf32>
    %c1 = arith.constant 1 : index
    %c0_15 = arith.constant 0 : index
    %c0_16 = arith.constant 0 : index
    %33 = vector.load %arg1[%c1, %c0_15, %c0_16] : memref<2x1x8xf32, #tpu.memory_space<vmem>>, vector<1x1x8xf32>
    %34 = vector.shape_cast %33 : vector<1x1x8xf32> to vector<1x8xf32>
    %35 = vector.broadcast %34 : vector<1x8xf32> to vector<8x8xf32>
    %36 = arith.addf %32, %35 : vector<8x8xf32>
    %cst_17 = arith.constant dense<0xFF800000> : vector<8xf32>
    %37 = vector.multi_reduction <maximumf>, %36, %cst_17 [1] : vector<8x8xf32> to vector<8xf32>
    %38 = vector.shape_cast %37 : vector<8xf32> to vector<8x1xf32>
    %39 = vector.broadcast %38 : vector<8x1xf32> to vector<8x8xf32>
    %40 = arith.subf %36, %39 : vector<8x8xf32>
    %41 = math.exp %40 : vector<8x8xf32>
    %cst_18 = arith.constant dense<0.000000e+00> : vector<8xf32>
    %42 = vector.multi_reduction <add>, %41, %cst_18 [1] : vector<8x8xf32> to vector<8xf32>
    %43 = vector.shape_cast %42 : vector<8xf32> to vector<8x1xf32>
    %44 = tpu.reciprocal %43 {approx = true} : vector<8x1xf32> -> vector<8x1xf32>
    %45 = vector.broadcast %44 : vector<8x1xf32> to vector<8x8xf32>
    %46 = arith.mulf %41, %45 : vector<8x8xf32>
    %cst_19 = arith.constant dense<0.000000e+00> : vector<8x32xf32>
    %47 = tpu.matmul %46, %29, %cst_19 {dimension_numbers = #tpu.dot_dimension_numbers<[1], [0], [0], [1], [0, 0, 1, 1], [], []>} : vector<8x8xf32>, vector<8x32xf32>, vector<8x32xf32> -> vector<8x32xf32>
    %c0_20 = arith.constant 0 : index
    %c0_21 = arith.constant 0 : index
    %c0_22 = arith.constant 0 : index
    %48 = vector.load %arg4[%c0_20, %c0_21, %c0_22] : memref<2x32x32xf32, #tpu.memory_space<vmem>>, vector<1x32x32xf32>
    %49 = vector.shape_cast %48 : vector<1x32x32xf32> to vector<32x32xf32>
    %c0_23 = arith.constant 0 : index
    %c0_24 = arith.constant 0 : index
    %c0_25 = arith.constant 0 : index
    %50 = vector.load %arg5[%c0_23, %c0_24, %c0_25] : memref<2x32x32xf32, #tpu.memory_space<vmem>>, vector<1x32x32xf32>
    %51 = vector.shape_cast %50 : vector<1x32x32xf32> to vector<32x32xf32>
    %c0_26 = arith.constant 0 : index
    %c0_27 = arith.constant 0 : index
    %c0_28 = arith.constant 0 : index
    %52 = vector.load %arg6[%c0_26, %c0_27, %c0_28] : memref<2x1x32xf32, #tpu.memory_space<vmem>>, vector<1x1x32xf32>
    %53 = vector.shape_cast %52 : vector<1x1x32xf32> to vector<1x32xf32>
    %cst_29 = arith.constant 0.000000e+00 : f32
    %54 = vector.broadcast %cst_29 : f32 to vector<8x32xf32>
    %cst_30 = arith.constant dense<0.000000e+00> : vector<8x32xf32>
    %55 = tpu.matmul %26, %49, %cst_30 {dimension_numbers = #tpu.dot_dimension_numbers<[1], [0], [0], [1], [0, 0, 1, 1], [], []>} : vector<8x32xf32>, vector<32x32xf32>, vector<8x32xf32> -> vector<8x32xf32>
    %cst_31 = arith.constant dense<0.000000e+00> : vector<8x32xf32>
    %56 = tpu.matmul %54, %51, %cst_31 {dimension_numbers = #tpu.dot_dimension_numbers<[1], [0], [0], [1], [0, 0, 1, 1], [], []>} : vector<8x32xf32>, vector<32x32xf32>, vector<8x32xf32> -> vector<8x32xf32>
    %57 = arith.addf %55, %56 : vector<8x32xf32>
    %58 = vector.broadcast %53 : vector<1x32xf32> to vector<8x32xf32>
    %59 = arith.addf %57, %58 : vector<8x32xf32>
    %60 = math.tanh %59 : vector<8x32xf32>
    %cst_32 = arith.constant dense<0.000000e+00> : vector<8x32xf32>
    %61 = tpu.matmul %47, %49, %cst_32 {dimension_numbers = #tpu.dot_dimension_numbers<[1], [0], [0], [1], [0, 0, 1, 1], [], []>} : vector<8x32xf32>, vector<32x32xf32>, vector<8x32xf32> -> vector<8x32xf32>
    %cst_33 = arith.constant dense<0.000000e+00> : vector<8x32xf32>
    %62 = tpu.matmul %60, %51, %cst_33 {dimension_numbers = #tpu.dot_dimension_numbers<[1], [0], [0], [1], [0, 0, 1, 1], [], []>} : vector<8x32xf32>, vector<32x32xf32>, vector<8x32xf32> -> vector<8x32xf32>
    %63 = arith.addf %61, %62 : vector<8x32xf32>
    %64 = vector.broadcast %53 : vector<1x32xf32> to vector<8x32xf32>
    %65 = arith.addf %63, %64 : vector<8x32xf32>
    %66 = math.tanh %65 : vector<8x32xf32>
    %c1_34 = arith.constant 1 : index
    %c0_35 = arith.constant 0 : index
    %c0_36 = arith.constant 0 : index
    %67 = vector.load %arg4[%c1_34, %c0_35, %c0_36] : memref<2x32x32xf32, #tpu.memory_space<vmem>>, vector<1x32x32xf32>
    %68 = vector.shape_cast %67 : vector<1x32x32xf32> to vector<32x32xf32>
    %c1_37 = arith.constant 1 : index
    %c0_38 = arith.constant 0 : index
    %c0_39 = arith.constant 0 : index
    %69 = vector.load %arg5[%c1_37, %c0_38, %c0_39] : memref<2x32x32xf32, #tpu.memory_space<vmem>>, vector<1x32x32xf32>
    %70 = vector.shape_cast %69 : vector<1x32x32xf32> to vector<32x32xf32>
    %c1_40 = arith.constant 1 : index
    %c0_41 = arith.constant 0 : index
    %c0_42 = arith.constant 0 : index
    %71 = vector.load %arg6[%c1_40, %c0_41, %c0_42] : memref<2x1x32xf32, #tpu.memory_space<vmem>>, vector<1x1x32xf32>
    %72 = vector.shape_cast %71 : vector<1x1x32xf32> to vector<1x32xf32>
    %cst_43 = arith.constant 0.000000e+00 : f32
    %73 = vector.broadcast %cst_43 : f32 to vector<8x32xf32>
    %cst_44 = arith.constant dense<0.000000e+00> : vector<8x32xf32>
    %74 = tpu.matmul %60, %68, %cst_44 {dimension_numbers = #tpu.dot_dimension_numbers<[1], [0], [0], [1], [0, 0, 1, 1], [], []>} : vector<8x32xf32>, vector<32x32xf32>, vector<8x32xf32> -> vector<8x32xf32>
    %cst_45 = arith.constant dense<0.000000e+00> : vector<8x32xf32>
    %75 = tpu.matmul %73, %70, %cst_45 {dimension_numbers = #tpu.dot_dimension_numbers<[1], [0], [0], [1], [0, 0, 1, 1], [], []>} : vector<8x32xf32>, vector<32x32xf32>, vector<8x32xf32> -> vector<8x32xf32>
    %76 = arith.addf %74, %75 : vector<8x32xf32>
    %77 = vector.broadcast %72 : vector<1x32xf32> to vector<8x32xf32>
    %78 = arith.addf %76, %77 : vector<8x32xf32>
    %79 = math.tanh %78 : vector<8x32xf32>
    %cst_46 = arith.constant dense<0.000000e+00> : vector<8x32xf32>
    %80 = tpu.matmul %66, %68, %cst_46 {dimension_numbers = #tpu.dot_dimension_numbers<[1], [0], [0], [1], [0, 0, 1, 1], [], []>} : vector<8x32xf32>, vector<32x32xf32>, vector<8x32xf32> -> vector<8x32xf32>
    %cst_47 = arith.constant dense<0.000000e+00> : vector<8x32xf32>
    %81 = tpu.matmul %79, %70, %cst_47 {dimension_numbers = #tpu.dot_dimension_numbers<[1], [0], [0], [1], [0, 0, 1, 1], [], []>} : vector<8x32xf32>, vector<32x32xf32>, vector<8x32xf32> -> vector<8x32xf32>
    %82 = arith.addf %80, %81 : vector<8x32xf32>
    %83 = vector.broadcast %72 : vector<1x32xf32> to vector<8x32xf32>
    %84 = arith.addf %82, %83 : vector<8x32xf32>
    %85 = math.tanh %84 : vector<8x32xf32>
    %cst_48 = arith.constant dense<0.000000e+00> : vector<32xf32>
    %86 = vector.multi_reduction <add>, %79, %cst_48 [0] : vector<8x32xf32> to vector<32xf32>
    %87 = vector.shape_cast %86 : vector<32xf32> to vector<1x32xf32>
    %cst_49 = arith.constant 8.000000e+00 : f32
    %88 = vector.broadcast %cst_49 : f32 to vector<1x32xf32>
    %89 = arith.divf %87, %88 : vector<1x32xf32>
    %cst_50 = arith.constant dense<0.000000e+00> : vector<32xf32>
    %90 = vector.multi_reduction <add>, %85, %cst_50 [0] : vector<8x32xf32> to vector<32xf32>
    %91 = vector.shape_cast %90 : vector<32xf32> to vector<1x32xf32>
    %cst_51 = arith.constant 8.000000e+00 : f32
    %92 = vector.broadcast %cst_51 : f32 to vector<1x32xf32>
    %93 = arith.divf %91, %92 : vector<1x32xf32>
    %94 = tpu.concatenate %89, %93 in 0 : vector<1x32xf32>, vector<1x32xf32> -> vector<2x32xf32>
    %c0_52 = arith.constant 0 : index
    %c0_53 = arith.constant 0 : index
    %95 = vector.load %arg7[%c0_52, %c0_53] : memref<32x5xf32, #tpu.memory_space<vmem>>, vector<32x5xf32>
    %cst_54 = arith.constant dense<0.000000e+00> : vector<2x5xf32>
    %96 = tpu.matmul %94, %95, %cst_54 {dimension_numbers = #tpu.dot_dimension_numbers<[1], [0], [0], [1], [0, 0, 1, 1], [], []>} : vector<2x32xf32>, vector<32x5xf32>, vector<2x5xf32> -> vector<2x5xf32>
    %c0_55 = arith.constant 0 : index
    %c0_56 = arith.constant 0 : index
    %97 = vector.load %arg8[%c0_55, %c0_56] : memref<1x5xf32, #tpu.memory_space<vmem>>, vector<1x5xf32>
    %98 = vector.broadcast %97 : vector<1x5xf32> to vector<2x5xf32>
    %99 = arith.addf %96, %98 : vector<2x5xf32>
    %cst_57 = arith.constant dense<0xFF800000> : vector<2xf32>
    %100 = vector.multi_reduction <maximumf>, %99, %cst_57 [1] : vector<2x5xf32> to vector<2xf32>
    %101 = vector.shape_cast %100 : vector<2xf32> to vector<2x1xf32>
    %102 = vector.broadcast %101 : vector<2x1xf32> to vector<2x5xf32>
    %103 = arith.subf %99, %102 : vector<2x5xf32>
    %104 = math.exp %103 : vector<2x5xf32>
    %cst_58 = arith.constant dense<0.000000e+00> : vector<2xf32>
    %105 = vector.multi_reduction <add>, %104, %cst_58 [1] : vector<2x5xf32> to vector<2xf32>
    %106 = vector.shape_cast %105 : vector<2xf32> to vector<2x1xf32>
    %107 = math.log %106 : vector<2x1xf32>
    %108 = vector.broadcast %107 : vector<2x1xf32> to vector<2x5xf32>
    %109 = arith.subf %103, %108 : vector<2x5xf32>
    %c0_59 = arith.constant 0 : index
    %c0_60 = arith.constant 0 : index
    %110 = vector.load %arg9[%c0_59, %c0_60] : memref<2x5xf32, #tpu.memory_space<vmem>>, vector<2x5xf32>
    tpu.vector_store %arg9[%c0_59, %c0_60], %109 {strides = array<i32>} : memref<2x5xf32, #tpu.memory_space<vmem>>, vector<2x5xf32>,
    return
  }
}

</mosaic_0001>

<bundles_post_ra>
// kernel: tpu_custom_call.1
= control target key start
LH: loop header
LB: loop body
LE: loop exit
PB: predicated region body
PF: predicated region fallthrough
CT: control target
= control target key end

     0   :  { %14 = vsyncpa [#allocation3], 0  ;;  %s1911_s0 = inlined_call_operand.hbm [shape: f32[16,32], index: 0, kind: input, shape index: {}]   ;;  %s1912_s1 = inlined_call_operand.vmem [shape: f32[2,1,8], index: 1, kind: input, shape index: {}]   ;;  %s1913_s2 = inlined_call_operand.vmem [shape: f32[32,96], index: 2, kind: input, shape index: {}]   ;;  %s1914_s3 = inlined_call_operand.vmem [shape: f32[1,96], index: 3, kind: input, shape index: {}]   ;;  %s1915_s4 = inlined_call_operand.hbm [shape: f32[2,32,32], index: 4, kind: input, shape index: {}]   ;;  %s1916_s5 = inlined_call_operand.hbm [shape: f32[2,32,32], index: 5, kind: input, shape index: {}]   ;;  %s1917_s6 = inlined_call_operand.vmem [shape: f32[2,1,32], index: 6, kind: input, shape index: {}]   ;;  %s1918_s7 = inlined_call_operand.vmem [shape: f32[32,5], index: 7, kind: input, shape index: {}]   ;;  %s1919_s8 = inlined_call_operand.vmem [shape: f32[1,5], index: 8, kind: input, shape index: {}]   ;;  %s1920_s9 = inlined_call_operand.hbm [shape: f32[2,5], index: 9, kind: output, shape index: {}]  }
   0x1   :  { %15 = vsyncpa [#allocation6], 0 }
   0x2   :  { %16 = vsyncpa [#allocation4], 0  ;;  %s1668_s30 = smov [#allocation5]   ;;  %s1669_s11 = smov [#allocation2]  }
   0x3   :  { %s40_s10 = sshll.u32 %s1668_s30, 4  ;;  %s22_s12 = sshll.u32 %s1669_s11, 4  ;;  %s41_s10 = int_to_ptr.vmem [resolvable:$true] %s40_s10  ;;  %s1729_s12 = int_to_ptr.vmem [resolvable:$true] %s22_s12 }
   0x4   :  { %s1574_s15 = scalar_lea.hbm %s1915_s4, 1024 }
   0x5   :  { %p1575_p0 = scmp.ne.s32.totalorder %s1915_s4, %s1574_s15  ;;  %p1578_p1 = scmp.lt.u32.totalorder %s1574_s15, %s1915_s4 }
   0x7   :  { %p1580_p2 = pnand %p1578_p1, %p1575_p0 }
   0x9   :  { %1583 = shalt.err (!%p1580_p2)
}
   0xa   :  { %s1584_s20 = scalar_lea.vmem %s41_s10, 1024  ;;  %p1589_p4 = scmp.lt.s32.totalorder %s41_s10, %s41_s10 }
   0xb   :  { %p1585_p3 = scmp.ne.s32.totalorder %s41_s10, %s1584_s20  ;;  %p1590_p5 = scmp.lt.s32.totalorder %s1584_s20, %s1584_s20 }
   0xd   :  { %p1591_p6 = por %p1590_p5, %p1589_p4 }
   0xf   :  { %p1592_p7 = pnand %p1591_p6, %p1585_p3 }
  0x11   :  { %1595 = shalt.err (!%p1592_p7)
}
  0x12   :  { %s1670_s21 = smov 128   ;;  %s1671_s22 = smov 8  }
  0x13   :  { %46 = dma.hbm_to_vmem [thread:$0]  %s1915_s4, 1024, %s41_s10, [#allocation6], %s1670_s21, %s1670_s21, %s1671_s22  }
  0x14   :  { %s1596_s27 = scalar_lea.hbm %s1911_s0, 256 }
  0x15   :  { %p1597_p8 = scmp.ne.s32.totalorder %s1911_s0, %s1596_s27  ;;  %p1600_p9 = scmp.lt.u32.totalorder %s1596_s27, %s1911_s0 }
  0x17   :  { %p1602_p10 = pnand %p1600_p9, %p1597_p8 }
  0x19   :  { %1605 = shalt.err (!%p1602_p10)
}
  0x1a   :  { %s1606_s13 = scalar_lea.vmem %s1729_s12, 256  ;;  %p1611_p12 = scmp.lt.s32.totalorder %s1729_s12, %s1729_s12 }
  0x1b   :  { %p1607_p11 = scmp.ne.s32.totalorder %s1729_s12, %s1606_s13  ;;  %p1612_p13 = scmp.lt.s32.totalorder %s1606_s13, %s1606_s13 }
  0x1d   :  { %p1613_p0 = por %p1612_p13, %p1611_p12 }
  0x1f   :  { %p1614_p1 = pnand %p1613_p0, %p1607_p11 }
  0x21   :  { %1617 = shalt.err (!%p1614_p1)
}
  0x22   :  { %28 = dma.hbm_to_vmem [thread:$0]  %s1911_s0, 256, %s1729_s12, [#allocation3], %s1670_s21, %s1670_s21, %s1671_s22  }
  0x23   :  { %s1672_s14 = smov [#allocation7]   ;;  %s1618_s18 = scalar_lea.hbm %s1916_s5, 1024 }
  0x24   :  { %s52_s15 = sshll.u32 %s1672_s14, 4  ;;  %p1619_p2 = scmp.ne.s32.totalorder %s1916_s5, %s1618_s18  ;;  %s53_s15 = int_to_ptr.vmem [resolvable:$true] %s52_s15 }
  0x25   :  { %p1622_p3 = scmp.lt.u32.totalorder %s1618_s18, %s1916_s5 }
  0x27   :  { %p1624_p4 = pnand %p1622_p3, %p1619_p2 }
  0x29   :  { %1627 = shalt.err (!%p1624_p4)
}
  0x2a   :  { %s1628_s25 = scalar_lea.vmem %s53_s15, 1024  ;;  %p1633_p6 = scmp.lt.s32.totalorder %s53_s15, %s53_s15 }
  0x2b   :  { %p1629_p5 = scmp.ne.s32.totalorder %s53_s15, %s1628_s25  ;;  %p1634_p7 = scmp.lt.s32.totalorder %s1628_s25, %s1628_s25 }
  0x2d   :  { %p1635_p8 = por %p1634_p7, %p1633_p6 }
  0x2f   :  { %p1636_p9 = pnand %p1635_p8, %p1629_p5 }
  0x31   :  { %1639 = shalt.err (!%p1636_p9)
}
  0x32   :  { %58 = dma.hbm_to_vmem [thread:$0]  %s1916_s5, 1024, %s53_s15, [#allocation6], %s1670_s21, %s1670_s21, %s1671_s22  }
  0x33   :  { %1662 = dma.done.wait [#allocation3], 256  }
  0x34   :  { %1663 = vsyncadd [#allocation3], 4294967040 }
  0x35   :  { %1664 = dma.done.wait [#allocation6], 2048  }
  0x36   :  { %1665 = vsyncadd [#allocation6], 4294965248  ;;  %vm87_vm0 = vcmask 261120   ;;  %v76_v0 = vld [vmem:[%s1913_s2] sm:$0xff]  ;;  %v77_v1 = vld [vmem:[%s1913_s2 + $0x8] sm:$0xff]  ;;  %v1673_v8 = vmov 0.0  }
  0x37   :  { %v78_v2 = vld [vmem:[%s1913_s2 + $0x10] sm:$0xff]  ;;  %v1481_v3 = vpack.c.bf16 %v77_v1, %v76_v0  ;;  %v79_v4 = vld [vmem:[%s1913_s2 + $0x18] sm:$0xff]  ;;  %v74_v5 = vld [vmem:[#allocation2] sm:$0xff]  ;;  %1362 = vmatprep.subr.mxu1 %v1673_v8  ;;  %vm1674_vm1 = vmmov 0   ;;  %s1675_s22 = smov 64   ;;  %s1676_s4 = smov 96  }
  0x38   :  { %v1485_v6 = vpack.c.bf16 %v79_v4, %v78_v2  ;;  %1359 = vmatprep.mubr.msk.f32.mxu0 %vm87_vm0, %v74_v5  ;;  %v75_v7 = vld [vmem:[#allocation2 + $0x8] sm:$0xff]  ;;  %1364 = vmatprep.mubr.msk.f32.mxu1 %vm1674_vm1, %v1673_v8  ;;  %v1269_v9 = vld [vmem:[%s1914_s3] ss:$0 sm:$0xff]  ;;  %vm255_vm2 = vcmask 64512   ;;  %v1279_v34 = vld [vmem:[%s1912_s1 + $0x1] ss:$0 sm:$0xff] }
  0x39   :  { %1482 = vmatprep.subr.bf16.mxu0 %v1481_v3  ;;  %v1274_v17 = vld [vmem:[%s1912_s1] ss:$0 sm:$0xff]  ;;  %v521_v44 = vld [vmem:[#allocation7] sm:$0xff]  ;;  %v522_v45 = vld [vmem:[#allocation7 + $0x8] sm:$0xff]  ;;  %v1677_v47 = vmov 0.0|0.0   ;;  %vm1153_vm3 = vcmask 1040384  }
  0x3a   :  { %1484 = vmatpush3.bf16.msra.mxu0 %v1481_v3  ;;  %v1490_v46 = vpack.c.bf16 %v522_v45, %v521_v44  ;;  %v523_v48 = vld [vmem:[#allocation7 + $0x10] sm:$0xff]  ;;  %v524_v49 = vld [vmem:[#allocation7 + $0x18] sm:$0xff]  ;;  %v517_v53 = vld [vmem:[#allocation5] sm:$0xff]  ;;  %vm1239_vm4 = vcmask 33792   ;;  %s1678_s27 = smov [#allocation8]  }
  0x3b   :  { %1486 = vmatprep.subr.bf16.mxu0 %v1485_v6  ;;  %v1493_v50 = vpack.c.bf16 %v524_v49, %v523_v48  ;;  %v518_v54 = vld [vmem:[#allocation5 + $0x8] sm:$0xff]  ;;  %v519_v58 = vld [vmem:[#allocation5 + $0x10] sm:$0xff]  ;;  %v520_v59 = vld [vmem:[#allocation5 + $0x18] sm:$0xff] }
  0x3c   :  { %v1496_v56 = vpack.c.bf16 %v518_v54, %v517_v53  ;;  %v1499_v60 = vpack.c.bf16 %v520_v59, %v519_v58  ;;  %v829_v63 = vld [vmem:[#allocation5 + $0x20] sm:$0xff]  ;;  %v830_v0 = vld [vmem:[#allocation5 + $0x28] sm:$0xff]  ;;  %v831_v2 = vld [vmem:[#allocation5 + $0x30] sm:$0xff] }
  0x3d   :  { %v1520_v1 = vpack.c.bf16 %v830_v0, %v829_v63  ;;  %v832_v3 = vld [vmem:[#allocation5 + $0x38] sm:$0xff]  ;;  %v1290_v0 = vld [vmem:[%s1919_s8] ss:$0 sm:$0xff]  ;;  %s1259_s8 = sshll.u32 %s1678_s27, 4  ;;  %s1260_s8 = int_to_ptr.vmem [resolvable:$true] %s1259_s8 }
  0x3e   :  { %1488 = vmatpush3.bf16.msra.mxu0 %v1485_v6  ;;  %v1523_v6 = vpack.c.bf16 %v832_v3, %v831_v2  ;;  %s1640_s28 = scalar_lea.vmem %s1260_s8, 32  ;;  %p1645_p11 = scmp.lt.s32.totalorder %s1260_s8, %s1260_s8 }
  0x3f   :  { %1489 = vmatprep.subr.bf16.mxu0 %v1677_v47  ;;  %p1641_p10 = scmp.ne.s32.totalorder %s1260_s8, %s1640_s28  ;;  %p1646_p12 = scmp.lt.s32.totalorder %s1640_s28, %s1640_s28 }
  0x41   :  { %1360 = vmatmul.mubr.msk.f32.vlgmr.msra.gmra.mrb[0].mxu0 %vm87_vm0, %v75_v7  ;;  %v1282_v7 = vld [vmem:[%s1917_s6] ss:$0 sm:$0xff]  ;;  %p1647_p13 = por %p1646_p12, %p1645_p11 }
  0x42   :  { %1390 = vmatprep.mubr.msk.f32.mxu0 %vm1674_vm1, %v1673_v8  ;;  %1491 = vmatpush3.bf16.msra.mxu0 %v1490_v46 }
  0x43   :  { %1492 = vmatprep.subr.bf16.mxu0 %v1677_v47  ;;  %p1648_p0 = pnand %p1647_p13, %p1641_p10 }
  0x46   :  { %1494 = vmatpush3.bf16.msra.mxu0 %v1493_v50 }
  0x47   :  { %1501 = vmatprep.subr.bf16.mxu0 %v1677_v47 }
  0x49   :  { %1391 = vmatmul.mubr.f32.vlgmr.msra.gmra.mrb[2].mxu0 %v1673_v8 }
  0x4a   :  { %1503 = vmatpush3.bf16.msra.mxu0 %v1490_v46  ;;  %1412 = vmatprep.mubr.msk.f32.mxu0 %vm1674_vm1, %v1673_v8 }
  0x4b   :  { %1504 = vmatprep.subr.bf16.mxu0 %v1677_v47 }
  0x4e   :  { %1506 = vmatpush3.bf16.msra.mxu0 %v1493_v50 }
  0x4f   :  { %1513 = vmatprep.subr.bf16.mxu0 %v1677_v47 }
 0x114   :  { %v1361_v10 = vpop.f32.mrb[0].mxu0 }
 0x115   :  { %v166_v11 = vadd.f32 %v1361_v10, %v1269_v9  ;;  %v160_v12 = vpop.f32.mrb[1].mxu0 }
 0x116   :  { %v161_v13 = vadd.f32 %v1269_v9, %v160_v12 }
 0x118   :  { %267 = vrot.lane.b32.xlu1 %v161_v13, %s1675_s22  ;;  %170 = vrot.lane.b32.xlu0 %v161_v13, %s1676_s4 }
 0x11c   :  { %v595_v61 = vpop.f32.mrb[2].mxu0 }
 0x11d   :  { %v1392_v62 = vpop.f32.mrb[3].mxu0 }
 0x18a   :  { %v171_v14 = vpop.permute.xlu0 %170  ;;  %v268_v15 = vpop.permute.xlu1 %267 }
 0x18b   :  { %1363 = vmatpush3.xpose.msk.msra.mxu1 %vm87_vm0, %v171_v14  ;;  %v835_v14 = vld [vmem:[#allocation7 + $0x28] sm:$0xff] }
 0x18c   :  { %1367 = vmatprep.subr.mxu1 %v1673_v8 }
 0x18e   :  { %1365 = vmatmul.mubr.msk.f32.vlgmr.msra.gmra.mrb[0].mxu1 %vm87_vm0, %v161_v13  ;;  %v834_v13 = vld [vmem:[#allocation7 + $0x20] sm:$0xff] }
 0x18f   :  { %1368 = vmatpush3.msra.mxu1 %v268_v15  ;;  %1369 = vmatprep.mubr.msk.f32.mxu1 %vm1674_vm1, %v1673_v8  ;;  %v1514_v15 = vpack.c.bf16 %v835_v14, %v834_v13 }
 0x190   :  { %1372 = vmatprep.subr.mxu1 %v1673_v8 }
 0x261   :  { %v242_v16 = vpop.f32.mrb[0].mxu1 }
 0x262   :  { %v246_v18 = vmul.f32 0.17677669, %v242_v16  ;;  %v1366_v19 = vpop.f32.mrb[1].mxu1  ;;  %v836_v16 = vld [vmem:[#allocation7 + $0x30] sm:$0xff] }
 0x264   :  { %v254_v20 = vadd.f32 %v1274_v17, %v246_v18  ;;  %v837_v17 = vld [vmem:[#allocation7 + $0x38] sm:$0xff] }
 0x265   :  { %v1517_v19 = vpack.c.bf16 %v837_v17, %v836_v16 }
 0x266   :  { %v256_v21 = vsel %vm255_vm2, %v254_v20, -inf }
 0x267   :  { %257 = vmax.xlane.f32.xlu0 %v256_v21 }
 0x2f4   :  { %v258_v22 = vpop.xlane.xlu0 %257 }
 0x2f5   :  { %v259_v23 = vsub.f32 %v254_v20, %v258_v22 }
 0x2f7   :  { %v260_v24 = vmul.f32 1.442695, %v259_v23 }
 0x2f9   :  { %1554 = vpow2.f32 %v260_v24 }
 0x303   :  { %v1555_v25 = vpop.eup %1554 }
 0x304   :  { %v262_v26 = vsel %vm255_vm2, %v1555_v25, 0.0 }
 0x305   :  { %263 = vadd.xlane.f32.xlu1 %v262_v26 }
 0x316   :  { %344 = vrot.lane.b32.xlu1 %v166_v11, %s1676_s4 }
 0x392   :  { %v264_v27 = vpop.xlane.xlu1 %263 }
 0x393   :  { %1556 = vrcp.f32 %v264_v27 }
 0x396   :  { %v345_v30 = vpop.permute.xlu1 %344 }
 0x39d   :  { %v1557_v28 = vpop.eup %1556 }
 0x39e   :  { %v266_v29 = vmul.f32 %v1557_v28, %v1555_v25  ;;  %v1287_v28 = vld [vmem:[%s1917_s6 + $0x1] ss:$0 sm:$0xff] }
 0x3a0   :  { %1370 = vmatmul.mubr.msk.f32.vlgmr.msra.gmra.mrb[2].mxu1 %vm255_vm2, %v266_v29 }
 0x3a1   :  { %1373 = vmatpush3.xpose.msk.msra.mxu1 %vm87_vm0, %v345_v30  ;;  %1374 = vmatprep.mubr.msk.f32.mxu1 %vm1674_vm1, %v1673_v8 }
 0x3a2   :  { %1377 = vmatprep.subr.mxu1 %v1673_v8 }
 0x3a4   :  { %1375 = vmatmul.mubr.msk.f32.vlgmr.msra.gmra.mrb[4].mxu1 %vm87_vm0, %v166_v11 }
 0x3a5   :  { %1379 = vmatprep.mubr.msk.f32.mxu1 %vm1674_vm1, %v1673_v8 }
 0x473   :  { %v339_v31 = vpop.f32.mrb[2].mxu1 }
 0x474   :  { %v1371_v32 = vpop.f32.mrb[3].mxu1 }
 0x477   :  { %v416_v33 = vpop.f32.mrb[4].mxu1 }
 0x478   :  { %v420_v35 = vmul.f32 0.17677669, %v416_v33  ;;  %v1376_v36 = vpop.f32.mrb[5].mxu1 }
 0x479   :  { %v1156_v36 = vld [vmem:[%s1918_s7 + $0x8] sm:$0xff] }
 0x47a   :  { %v429_v37 = vadd.f32 %v1279_v34, %v420_v35  ;;  %v1155_v35 = vld [vmem:[%s1918_s7] sm:$0xff] }
 0x47c   :  { %v430_v38 = vsel %vm255_vm2, %v429_v37, -inf }
 0x47d   :  { %431 = vmax.xlane.f32.xlu1 %v430_v38  ;;  %v1538_v38 = vpack.c.bf16 %v1156_v36, %v1155_v35 }
 0x50a   :  { %v432_v39 = vpop.xlane.xlu1 %431 }
 0x50b   :  { %v433_v40 = vsub.f32 %v429_v37, %v432_v39  ;;  %v1157_v37 = vld [vmem:[%s1918_s7 + $0x10] sm:$0xff]  ;;  %v1158_v39 = vld [vmem:[%s1918_s7 + $0x18] sm:$0xff] }
 0x50d   :  { %v434_v41 = vmul.f32 1.442695, %v433_v40  ;;  %v1541_v40 = vpack.c.bf16 %v1158_v39, %v1157_v37 }
 0x50f   :  { %1558 = vpow2.f32 %v434_v41 }
 0x519   :  { %v1559_v42 = vpop.eup %1558 }
 0x51a   :  { %v436_v43 = vsel %vm255_vm2, %v1559_v42, 0.0 }
 0x51b   :  { %437 = vadd.xlane.f32.xlu0 %v436_v43 }
 0x531   :  { %441 = vrot.lane.b32.xlu0 %v166_v11, %s1675_s22 }
 0x5a8   :  { %v438_v51 = vpop.xlane.xlu0 %437 }
 0x5a9   :  { %1560 = vrcp.f32 %v438_v51 }
 0x5ac   :  { %v442_v52 = vpop.permute.xlu0 %441 }
 0x5ad   :  { %1378 = vmatpush3.msra.mxu1 %v442_v52 }
 0x5ae   :  { %1495 = vmatprep.subr.bf16.mxu1 %v1677_v47 }
 0x5b3   :  { %v1561_v55 = vpop.eup %1560 }
 0x5b4   :  { %v440_v57 = vmul.f32 %v1561_v55, %v1559_v42 }
 0x5b6   :  { %1380 = vmatmul.mubr.msk.f32.vlgmr.msra.gmra.mrb[6].mxu1 %vm255_vm2, %v440_v57 }
 0x5b7   :  { %1497 = vmatpush3.bf16.msra.mxu1 %v1496_v56  ;;  %1401 = vmatprep.mubr.msk.f32.mxu1 %vm1674_vm1, %v1673_v8 }
 0x5b8   :  { %1498 = vmatprep.subr.bf16.mxu1 %v1677_v47 }
 0x5bb   :  { %1500 = vmatpush3.bf16.msra.mxu1 %v1499_v60 }
 0x5bc   :  { %1507 = vmatprep.subr.bf16.mxu1 %v1677_v47 }
 0x5be   :  { %1402 = vmatmul.mubr.msk.f32.vlgmr.msra.gmra.mrb[8].mxu1 %vm87_vm0, %v339_v31 }
 0x5bf   :  { %1509 = vmatpush3.bf16.msra.mxu1 %v1496_v56  ;;  %1423 = vmatprep.mubr.msk.f32.mxu1 %vm1674_vm1, %v1673_v8 }
 0x5c0   :  { %1510 = vmatprep.subr.bf16.mxu1 %v1677_v47 }
 0x5c3   :  { %1512 = vmatpush3.bf16.msra.mxu1 %v1499_v60 }
 0x5c4   :  { %1519 = vmatprep.subr.bf16.mxu1 %v1677_v47 }
 0x689   :  { %v513_v4 = vpop.f32.mrb[6].mxu1 }
 0x68a   :  { %v1381_v5 = vpop.f32.mrb[7].mxu1  ;;  %1424 = vmatmul.mubr.msk.f32.vlgmr.msra.gmra.mrb[10].mxu1 %vm87_vm0, %v513_v4 }
 0x68b   :  { %1521 = vmatpush3.bf16.msra.mxu1 %v1520_v1  ;;  %1445 = vmatprep.mubr.msk.f32.mxu1 %vm1674_vm1, %v1673_v8 }
 0x68c   :  { %1522 = vmatprep.subr.bf16.mxu1 %v1677_v47 }
 0x68f   :  { %1524 = vmatpush3.bf16.msra.mxu1 %v1523_v6 }
 0x690   :  { %1531 = vmatprep.subr.bf16.mxu1 %v1677_v47 }
 0x691   :  { %v668_v9 = vpop.f32.mrb[8].mxu1 }
 0x692   :  { %v669_v10 = vadd.f32 %v668_v9, %v595_v61  ;;  %v1403_v11 = vpop.f32.mrb[9].mxu1 }
 0x694   :  { %v678_v12 = vadd.f32 %v1282_v7, %v669_v10 }
 0x696   :  { %1562 = vtanh.f32 %v678_v12 }
 0x6a0   :  { %v1563_v18 = vpop.eup %1562 }
 0x6a1   :  { %1413 = vmatmul.mubr.msk.f32.vlgmr.msra.gmra.mrb[4].mxu0 %vm87_vm0, %v1563_v18  ;;  %1446 = vmatmul.mubr.msk.f32.vlgmr.msra.gmra.mrb[12].mxu1 %vm87_vm0, %v1563_v18 }
 0x6a2   :  { %1515 = vmatpush3.bf16.msra.mxu0 %v1514_v15  ;;  %1434 = vmatprep.mubr.msk.f32.mxu0 %vm1674_vm1, %v1673_v8 }
 0x6a3   :  { %1516 = vmatprep.subr.bf16.mxu0 %v1677_v47  ;;  %1533 = vmatpush3.bf16.msra.mxu1 %v1520_v1 }
 0x6a4   :  { %1534 = vmatprep.subr.bf16.mxu1 %v1677_v47  ;;  %1467 = vmatprep.mubr.msk.f32.mxu1 %vm1674_vm1, %v1673_v8 }
 0x6a6   :  { %1518 = vmatpush3.bf16.msra.mxu0 %v1517_v19 }
 0x6a7   :  { %1536 = vmatpush3.bf16.msra.mxu1 %v1523_v6  ;;  %1525 = vmatprep.subr.bf16.mxu0 %v1677_v47 }
 0x6a9   :  { %1435 = vmatmul.mubr.f32.vlgmr.msra.gmra.mrb[6].mxu0 %v1673_v8 }
 0x6aa   :  { %1527 = vmatpush3.bf16.msra.mxu0 %v1514_v15  ;;  %1456 = vmatprep.mubr.msk.f32.mxu0 %vm1674_vm1, %v1673_v8 }
 0x6ab   :  { %1528 = vmatprep.subr.bf16.mxu0 %v1677_v47 }
 0x6ae   :  { %1530 = vmatpush3.bf16.msra.mxu0 %v1517_v19 }
 0x6af   :  { %1537 = vmatprep.subr.bf16.mxu0 %v1677_v47 }
 0x75d   :  { %v822_v20 = vpop.f32.mrb[10].mxu1 }
 0x75e   :  { %v1425_v21 = vpop.f32.mrb[11].mxu1 }
 0x774   :  { %v749_v22 = vpop.f32.mrb[4].mxu0  ;;  %v976_v23 = vpop.f32.mrb[12].mxu1 }
 0x775   :  { %v823_v24 = vadd.f32 %v822_v20, %v749_v22  ;;  %v1414_v25 = vpop.f32.mrb[5].mxu0  ;;  %v1447_v26 = vpop.f32.mrb[13].mxu1 }
 0x777   :  { %v826_v27 = vadd.f32 %v1282_v7, %v823_v24 }
 0x779   :  { %1564 = vtanh.f32 %v826_v27 }
 0x77c   :  { %v906_v29 = vpop.f32.mrb[6].mxu0 }
 0x77d   :  { %v977_v30 = vadd.f32 %v976_v23, %v906_v29  ;;  %v1436_v31 = vpop.f32.mrb[7].mxu0 }
 0x77f   :  { %v986_v32 = vadd.f32 %v1287_v28, %v977_v30 }
 0x781   :  { %1566 = vtanh.f32 %v986_v32 }
 0x783   :  { %v1565_v33 = vpop.eup %1564 }
 0x784   :  { %1468 = vmatmul.mubr.msk.f32.vlgmr.msra.gmra.mrb[14].mxu1 %vm87_vm0, %v1565_v33 }
 0x78b   :  { %v1567_v34 = vpop.eup %1566 }
 0x78c   :  { %1457 = vmatmul.mubr.msk.f32.vlgmr.msra.gmra.mrb[8].mxu0 %vm87_vm0, %v1567_v34  ;;  %v1136_v45 = vsel %vm87_vm0, %v1567_v34, 0.0 }
 0x78d   :  { %1478 = vmatprep.mubr.msk.f32.mxu0 %vm1674_vm1, %v1673_v8  ;;  %1539 = vmatpush3.bf16.msra.mxu0 %v1538_v38  ;;  %v1137_v48 = vrot.slane %v1136_v45, 4 }
 0x78e   :  { %1540 = vmatprep.subr.bf16.mxu0 %v1677_v47 }
 0x78f   :  { %v1138_v49 = vadd.f32 %v1137_v48, %v1136_v45 }
 0x791   :  { %1542 = vmatpush3.bf16.msra.mxu0 %v1541_v40  ;;  %v1139_v50 = vrot.slane %v1138_v49, 2 }
 0x793   :  { %v1140_v54 = vadd.f32 %v1139_v50, %v1138_v49 }
 0x795   :  { %v1141_v47 = vrot.slane %v1140_v54, 1 }
 0x797   :  { %v1142_v58 = vadd.f32 %v1141_v47, %v1140_v54 }
 0x799   :  { %v1144_v61 = vmul.f32 0.125, %v1142_v58 }
 0x857   :  { %v1130_v8 = vpop.f32.mrb[14].mxu1 }
 0x858   :  { %v1469_v41 = vpop.f32.mrb[15].mxu1 }
 0x85f   :  { %v1057_v42 = vpop.f32.mrb[8].mxu0 }
 0x860   :  { %v1131_v43 = vadd.f32 %v1130_v8, %v1057_v42  ;;  %v1458_v44 = vpop.f32.mrb[9].mxu0 }
 0x862   :  { %v1134_v46 = vadd.f32 %v1287_v28, %v1131_v43 }
 0x864   :  { %1568 = vtanh.f32 %v1134_v46 }
 0x86e   :  { %v1569_v51 = vpop.eup %1568 }
 0x86f   :  { %v1145_v52 = vsel %vm87_vm0, %v1569_v51, 0.0 }
 0x870   :  { %v1146_v53 = vrot.slane %v1145_v52, 4 }
 0x872   :  { %v1147_v55 = vadd.f32 %v1146_v53, %v1145_v52 }
 0x874   :  { %v1148_v56 = vrot.slane %v1147_v55, 2 }
 0x876   :  { %v1149_v57 = vadd.f32 %v1148_v56, %v1147_v55 }
 0x878   :  { %v1150_v59 = vrot.slane %v1149_v57, 1 }
 0x87a   :  { %v1151_v60 = vadd.f32 %v1150_v59, %v1149_v57 }
 0x87c   :  { %v1152_v62 = vmul.f32 0.125, %v1151_v60 }
 0x87e   :  { %v1154_v63 = vsel %vm1153_vm3, %v1144_v61, %v1152_v62 }
 0x87f   :  { %1479 = vmatmul.mubr.msk.f32.vlgmr.msra.gmra.mrb[10].mxu0 %vm87_vm0, %v1154_v63 }
 0x952   :  { %v1235_v1 = vpop.f32.mrb[10].mxu0 }
 0x953   :  { %v1236_v2 = vadd.f32 %v1290_v0, %v1235_v1  ;;  %v1480_v3 = vpop.f32.mrb[11].mxu0 }
 0x955   :  { %v1240_v4 = vsel %vm1239_vm4, %v1236_v2, -inf }
 0x956   :  { %1241 = vmax.xlane.f32.xlu0 %v1240_v4 }
 0x9e3   :  { %v1242_v5 = vpop.xlane.xlu0 %1241 }
 0x9e4   :  { %v1243_v6 = vsub.f32 %v1236_v2, %v1242_v5 }
 0x9e6   :  { %v1244_v7 = vmul.f32 1.442695, %v1243_v6 }
 0x9e8   :  { %1570 = vpow2.f32 %v1244_v7 }
 0x9f2   :  { %v1571_v9 = vpop.eup %1570 }
 0x9f3   :  { %v1246_v10 = vsel %vm1239_vm4, %v1571_v9, 0.0 }
 0x9f4   :  { %1247 = vadd.xlane.f32.xlu1 %v1246_v10 }
 0xa81   :  { %v1248_v11 = vpop.xlane.xlu1 %1247 }
 0xa82   :  { %1572 = vlog2.f32 %v1248_v11 }
 0xa8c   :  { %v1573_v12 = vpop.eup %1572 }
 0xa8d   :  { %v1250_v13 = vmul.f32 0.6931472, %v1573_v12 }
 0xa8f   :  { %v1251_v14 = vsub.f32 %v1243_v6, %v1250_v13 }
 0xa91   :  { %1252 = vst.msk [vmem:[#allocation8] sm:$0x3] %vm1239_vm4, %v1251_v14 }
 0xa92   :  { %1651 = shalt.err (!%p1648_p0)
}
 0xa93   :  { %s1652_s11 = scalar_lea.hbm %s1920_s9, 32 }
 0xa94   :  { %p1653_p1 = scmp.ne.s32.totalorder %s1920_s9, %s1652_s11  ;;  %p1656_p2 = scmp.lt.u32.totalorder %s1652_s11, %s1920_s9 }
 0xa96   :  { %p1658_p3 = pnand %p1656_p2, %p1653_p1 }
 0xa98   :  { %1661 = shalt.err (!%p1658_p3)
}
 0xa99   :  { %1262 = dma.vmem_to_hbm [thread:$0]  %s1260_s8, 32, %s1920_s9, [#allocation4]  }
 0xa9a   :  { %1666 = dma.done.wait [#allocation4], 32  }
 0xa9b   :  { %1667 = vsyncadd [#allocation4], 4294967264 }
 0xa9c   :  { %1266 = vsyncpa [#allocation3], 1 }
 0xa9d   :  { %1267 = vsyncpa [#allocation6], 1 }
 0xa9e   :  { %1268 = vsyncpa [#allocation4], 1 }

</bundles_post_ra>
